<compile_context>
chip_gen: v6e
topology: v6e:2x2x1
jax: 0.10.0
libtpu: 0.0.40
codegen_flags: <defaults>
</compile_context>

<pallas_src>
import jax
import jax.numpy as jnp
from jax.experimental import pallas as pl
from jax.experimental.pallas import tpu as pltpu


# --------------------------------------------------------------- VMEM budget
_DEFAULT_PHYS_VMEM = 64 << 20  # conservative fallback (v7x per-TensorCore)


def _vmem_budget():
    """Returns (per-step working-set budget, explicit scoped vmem limit) in bytes."""
    phys = None
    try:
        info = pltpu.get_tpu_info()
        for attr in ("vmem_capacity_bytes", "vmem_size_bytes", "vmem_bytes"):
            val = getattr(info, attr, None)
            if val:
                phys = int(val)
                break
    except Exception:
        phys = None
    if not phys:
        phys = _DEFAULT_PHYS_VMEM
    vmem_limit = max(32 << 20, phys - (8 << 20))   # leave headroom for Mosaic internals
    budget = phys // 2                             # double-buffered blocks + resident weight
    return budget, vmem_limit


def _sublane_align(dtype):
    # f32 -> 8, bf16 -> 16, int8/fp8 -> 32 (packed rows travel along sublanes).
    return max(8, 32 // jnp.dtype(dtype).itemsize)


# ---------------------------------------------------------------- fused path
def _fused_kernel(feat_ref, wt_ref, b_ref, out_ref):
    # feat_ref: (1, N, n_in)   wt_ref: (n_in, n_global)   b_ref: (1, n_global) f32
    # out_ref:  (1, N, n_in + n_global)
    feat = feat_ref[0]                                         # (N, n_in)
    tran = jnp.dot(feat, wt_ref[...], preferred_element_type=jnp.float32)
    # Bias is a per-column constant: adding it after the (monotone) max is exact.
    glob = jnp.max(tran, axis=0, keepdims=True) + b_ref[...]   # (1, n_global) f32
    glob = glob.astype(out_ref.dtype)                          # cast the 1-row vector first
    glob_b = jnp.broadcast_to(glob, (feat.shape[0], glob.shape[1]))
    # Build the full tile in registers -> one lane-dense full-block store.
    out_ref[0] = jnp.concatenate([feat, glob_b], axis=-1)


def _fused_call(feat, wt, bias_f32, vmem_limit):
    B, N, n_in = feat.shape
    n_global = wt.shape[1]
    n_out = n_in + n_global
    return pl.pallas_call(
        _fused_kernel,
        out_shape=jax.ShapeDtypeStruct((B, N, n_out), feat.dtype),
        grid_spec=pltpu.PrefetchScalarGridSpec(
            num_scalar_prefetch=0,
            grid=(B,),
            in_specs=[
                pl.BlockSpec((1, N, n_in), lambda b: (b, 0, 0)),
                pl.BlockSpec((n_in, n_global), lambda b: (0, 0)),
                pl.BlockSpec((1, n_global), lambda b: (0, 0)),
            ],
            out_specs=pl.BlockSpec((1, N, n_out), lambda b: (b, 0, 0)),
        ),
        compiler_params=pltpu.CompilerParams(
            dimension_semantics=("parallel",),
            vmem_limit_bytes=vmem_limit),
    )(feat, wt, bias_f32)


# ---------------------------------------------------------------- tiled path
def _colmax_kernel(feat_ref, wt_ref, glob_ref):
    # feat_ref: (1, TN, n_in)   wt_ref: (n_in, n_global)
    # glob_ref: (1, 1, 1, n_global) f32 -- output block resident across the reduction
    #           axis (its block index is constant over the last grid axis), so it is
    #           used directly as the accumulator (no scratch, no epilogue copy).
    n = pl.program_id(2)

    @pl.when(n == 0)
    def _():
        glob_ref[...] = jnp.full_like(glob_ref, -jnp.inf)

    tran = jnp.dot(feat_ref[0], wt_ref[...], preferred_element_type=jnp.float32)
    glob_ref[0, 0] = jnp.maximum(glob_ref[0, 0],
                                 jnp.max(tran, axis=0, keepdims=True))


def _concat_kernel(feat_ref, glob_ref, out_ref):
    # feat_ref: (1, TN, n_in)   glob_ref: (1, 1, n_global) (already in output dtype)
    # out_ref:  (1, TN, n_in + n_global)
    feat = feat_ref[0]                                          # (TN, n_in)
    glob_b = jnp.broadcast_to(glob_ref[0], (feat.shape[0], glob_ref.shape[2]))
    out_ref[0] = jnp.concatenate([feat, glob_b], axis=-1)       # single full-tile store


def _tiled_call(feat, wt, bias_f32, tn, vmem_limit):
    B, N, n_in = feat.shape
    n_global = wt.shape[1]
    n_out = n_in + n_global

    n_tiles = pl.cdiv(N, tn)
    n_pad = n_tiles * tn - N
    if n_pad:
        # Pad with replicas of the last row: max-invariant, padded output rows are
        # sliced off below.
        pad = jnp.broadcast_to(feat[:, -1:, :], (B, n_pad, n_in))
        feat_p = jnp.concatenate([feat, pad], axis=1)
    else:
        feat_p = feat
    n_padded = N + n_pad

    # v7x: guarantee a parallel grid extent >= 2 when B == 1 by splitting the
    # reduction into two independent halves (combined by a tiny XLA max below).
    splits = 2 if (B == 1 and n_tiles >= 2 and n_tiles % 2 == 0) else 1
    tiles_per_split = n_tiles // splits

    # Phase 1: per-(split, batch) column max of feat @ W^T, reduced over N tiles.
    part = pl.pallas_call(
        _colmax_kernel,
        out_shape=jax.ShapeDtypeStruct((splits, B, 1, n_global), jnp.float32),
        grid_spec=pltpu.PrefetchScalarGridSpec(
            num_scalar_prefetch=0,
            grid=(B, splits, tiles_per_split),
            in_specs=[
                pl.BlockSpec((1, tn, n_in),
                             lambda b, s, n, tps=tiles_per_split: (b, s * tps + n, 0)),
                pl.BlockSpec((n_in, n_global), lambda b, s, n: (0, 0)),
            ],
            out_specs=pl.BlockSpec((1, 1, 1, n_global), lambda b, s, n: (s, b, 0, 0)),
        ),
        compiler_params=pltpu.CompilerParams(
            dimension_semantics=("parallel", "parallel", "arbitrary"),
            vmem_limit_bytes=vmem_limit),
    )(feat_p, wt)

    # Tiny combine: max over splits, bias after the max (exact), cast once.
    glob = (jnp.max(part, axis=0) + bias_f32).astype(feat.dtype)   # (B, 1, n_global)

    # Phase 2: tiled copy of feat + broadcast of glob into the output slab.
    out = pl.pallas_call(
        _concat_kernel,
        out_shape=jax.ShapeDtypeStruct((B, n_padded, n_out), feat.dtype),
        grid_spec=pltpu.PrefetchScalarGridSpec(
            num_scalar_prefetch=0,
            grid=(B, n_tiles),
            in_specs=[
                pl.BlockSpec((1, tn, n_in), lambda b, n: (b, n, 0)),
                pl.BlockSpec((1, 1, n_global), lambda b, n: (b, 0, 0)),
            ],
            out_specs=pl.BlockSpec((1, tn, n_out), lambda b, n: (b, n, 0)),
        ),
        compiler_params=pltpu.CompilerParams(
            dimension_semantics=("parallel", "parallel"),
            vmem_limit_bytes=vmem_limit),
    )(feat_p, glob)

    return out[:, :N, :] if n_pad else out


# ------------------------------------------------------------------- wrapper
def _pick_n_tile(N, max_rows, align, min_tiles=1):
    """Rows per tile: sublane-aligned, within max_rows, preferring exact divisors of N."""
    max_rows = max(align, (max_rows // align) * align)
    if min_tiles > 1:
        # Cap the tile so we get at least `min_tiles` pipeline steps when possible.
        cap = ((N + min_tiles - 1) // min_tiles + align - 1) // align * align
        max_rows = max(align, min(max_rows, cap))
    if N <= max_rows and min_tiles <= 1:
        return N                                    # single full-extent block
    # Largest aligned exact divisor of N not exceeding max_rows.
    best = 0
    cand = max_rows
    while cand >= align:
        if N % cand == 0:
            best = cand
            break
        cand -= align
    if best and best * 4 >= min(max_rows, 1024):
        return best
    # No reasonable divisor: use the largest aligned tile; caller pads N by row
    # replication (max-invariant).
    return max_rows


def global_info_prop(feat, weight, bias, *, force_n_tile=None):
    """feat: [B, N, n_in]; weight: [n_global, n_in] (torch nn.Linear layout); bias: [n_global]."""
    B, N, n_in = feat.shape
    n_global = weight.shape[0]
    n_out = n_in + n_global
    itemsize = jnp.dtype(feat.dtype).itemsize

    # One-time canonical MXU feed; bias kept f32 (added after the max).
    wt = jnp.transpose(weight)                       # (n_in, n_global)
    bias_f32 = bias.reshape(1, n_global).astype(jnp.float32)

    budget, vmem_limit = _vmem_budget()
    # Resident (grid-invariant, still double-buffered) weight + small slack.
    # TODO(synk): an n_global*n_in weight that alone exceeds VMEM would need a
    # K/N-tiled matmul inside the kernel; not handled here.
    w_bytes = 2 * n_in * n_global * jnp.dtype(weight.dtype).itemsize
    avail = max(budget - w_bytes - (256 << 10), 8 * (n_in + n_out) * itemsize)

    align = _sublane_align(feat.dtype)

    # Fused path: reads feat from HBM once (tiled path reads it twice); used when the
    # whole-N block fits the budget and B gives enough pipeline/parallel steps.
    fused_bytes = 2 * N * (n_in + n_out) * itemsize  # double-buffered in+out blocks
    if force_n_tile is None and fused_bytes <= avail and (B >= 2 or N < 4 * align):
        return _fused_call(feat, wt, bias_f32, vmem_limit)

    # Tiled two-phase path: tile bounded by both phases' working sets.
    max_rows_p1 = avail // (2 * n_in * itemsize)
    max_rows_p2 = avail // (2 * (n_in + n_out) * itemsize)
    max_rows = max(align, min(max_rows_p1, max_rows_p2))
    min_tiles = 4 if B == 1 else 1
    tn = force_n_tile if force_n_tile is not None else _pick_n_tile(
        N, max_rows, align, min_tiles)
    return _tiled_call(feat, wt, bias_f32, tn, vmem_limit)


# ----------------------------------------------------------------- reference
def _reference(feat, weight, bias):
    tran = jnp.einsum("bni,gi->bng", feat, weight) + bias
    glob = jnp.max(tran, axis=-2, keepdims=True)
    glob = jnp.broadcast_to(glob, feat.shape[:-1] + (tran.shape[-1],))
    return jnp.concatenate([feat, glob], axis=-1)


if __name__ == "__main__":
    n_in, n_global = 32, 16

    key = jax.random.PRNGKey(0)
    k_f1, k_f2, k_f3, k_f4, k_w, k_b = jax.random.split(key, 6)

    bound = 1.0 / (n_in ** 0.5)
    # nn.Linear layout: weight (n_global, n_in), bias (n_global,)
    weight = jax.random.uniform(k_w, (n_global, n_in), jnp.float32, -bound, bound)
    bias = jax.random.uniform(k_b, (n_global,), jnp.float32, -bound, bound)

    # 1) Small shape -> fused single-kernel path.
    feat1 = jax.random.normal(k_f1, (2, 8, n_in), dtype=jnp.float32)
    out1 = jax.block_until_ready(global_info_prop(feat1, weight, bias))
    assert out1.shape == (2, 8, n_in + n_global)
    assert jnp.allclose(out1, _reference(feat1, weight, bias), atol=1e-5, rtol=1e-5)

    # 2) Tiled two-phase path with an exact-divisor tile.
    feat2 = jax.random.normal(k_f2, (2, 32, n_in), dtype=jnp.float32)
    out2 = jax.block_until_ready(global_info_prop(feat2, weight, bias, force_n_tile=8))
    assert jnp.allclose(out2, _reference(feat2, weight, bias), atol=1e-5, rtol=1e-5)

    # 3) B == 1 -> tiled path with the split (2-way parallel) reduction axis.
    feat3 = jax.random.normal(k_f3, (1, 64, n_in), dtype=jnp.float32)
    out3 = jax.block_until_ready(global_info_prop(feat3, weight, bias, force_n_tile=16))
    assert jnp.allclose(out3, _reference(feat3, weight, bias), atol=1e-5, rtol=1e-5)

    # 4) N not divisible by the tile -> row-replication padding path.
    feat4 = jax.random.normal(k_f4, (2, 40, n_in), dtype=jnp.float32)
    out4 = jax.block_until_ready(global_info_prop(feat4, weight, bias, force_n_tile=16))
    assert out4.shape == (2, 40, n_in + n_global)
    assert jnp.allclose(out4, _reference(feat4, weight, bias), atol=1e-5, rtol=1e-5)

    print("KERNEL_OK")
</pallas_src>

<mosaic_0001>
module attributes {stable_mosaic.version = 11 : i64} {
  func.func @_fused_kernel(%arg0: i32, %arg1: memref<1x8x32xf32, #tpu.memory_space<vmem>>, %arg2: memref<32x16xf32, #tpu.memory_space<vmem>>, %arg3: memref<1x16xf32, #tpu.memory_space<vmem>>, %arg4: memref<1x8x48xf32, #tpu.memory_space<vmem>>) attributes {dimension_semantics = [#tpu.dimension_semantics<parallel>], iteration_bounds = array<i64: 2>, scalar_prefetch = 0 : i64, scratch_operands = 0 : i64, tpu.core_type = #tpu.core_type<tc>, window_params = [{transform_indices = @transform_0, window_bounds = array<i64: 1, 8, 32>}, {pipeline_mode = #tpu.pipeline_mode<synchronous>, transform_indices = @transform_1, window_bounds = array<i64: 32, 16>}, {pipeline_mode = #tpu.pipeline_mode<synchronous>, transform_indices = @transform_2, window_bounds = array<i64: 1, 16>}, {transform_indices = @transform_3, window_bounds = array<i64: 1, 8, 48>}]} {
    %c0 = arith.constant 0 : index
    %c0_0 = arith.constant 0 : index
    %c0_1 = arith.constant 0 : index
    %0 = vector.load %arg1[%c0, %c0_0, %c0_1] : memref<1x8x32xf32, #tpu.memory_space<vmem>>, vector<1x8x32xf32>
    %1 = vector.shape_cast %0 : vector<1x8x32xf32> to vector<8x32xf32>
    %c0_2 = arith.constant 0 : index
    %c0_3 = arith.constant 0 : index
    %2 = vector.load %arg2[%c0_2, %c0_3] : memref<32x16xf32, #tpu.memory_space<vmem>>, vector<32x16xf32>
    %cst = arith.constant dense<0.000000e+00> : vector<8x16xf32>
    %3 = tpu.matmul %1, %2, %cst {dimension_numbers = #tpu.dot_dimension_numbers<[1], [0], [0], [1], [0, 0, 1, 1], [], []>} : vector<8x32xf32>, vector<32x16xf32>, vector<8x16xf32> -> vector<8x16xf32>
    %cst_4 = arith.constant dense<0xFF800000> : vector<16xf32>
    %4 = vector.multi_reduction <maximumf>, %3, %cst_4 [0] : vector<8x16xf32> to vector<16xf32>
    %5 = vector.shape_cast %4 : vector<16xf32> to vector<1x16xf32>
    %c0_5 = arith.constant 0 : index
    %c0_6 = arith.constant 0 : index
    %6 = vector.load %arg3[%c0_5, %c0_6] : memref<1x16xf32, #tpu.memory_space<vmem>>, vector<1x16xf32>
    %7 = arith.addf %5, %6 : vector<1x16xf32>
    %8 = vector.shape_cast %7 : vector<1x16xf32> to vector<1x16xf32>
    %9 = vector.broadcast %8 : vector<1x16xf32> to vector<8x16xf32>
    %10 = tpu.concatenate %1, %9 in 1 : vector<8x32xf32>, vector<8x16xf32> -> vector<8x48xf32>
    %c0_7 = arith.constant 0 : index
    %c0_8 = arith.constant 0 : index
    %c0_9 = arith.constant 0 : index
    %11 = vector.load %arg4[%c0_7, %c0_8, %c0_9] : memref<1x8x48xf32, #tpu.memory_space<vmem>>, vector<1x8x48xf32>
    %12 = vector.shape_cast %11 : vector<1x8x48xf32> to vector<8x48xf32>
    %13 = vector.shape_cast %10 : vector<8x48xf32> to vector<1x8x48xf32>
    tpu.vector_store %arg4[%c0_7, %c0_8, %c0_9], %13 {strides = array<i32>} : memref<1x8x48xf32, #tpu.memory_space<vmem>>, vector<1x8x48xf32>,
    return
  }
  func.func @transform_0(%arg0: i32) -> (i32, i32, i32) {
    %c0_i32 = arith.constant 0 : i32
    %c0_i32_0 = arith.constant 0 : i32
    %c0_i32_1 = arith.constant 0 : i32
    return %arg0, %c0_i32, %c0_i32_0 : i32, i32, i32
  }
  func.func @transform_1(%arg0: i32) -> (i32, i32) {
    %c0_i32 = arith.constant 0 : i32
    %c0_i32_0 = arith.constant 0 : i32
    %c0_i32_1 = arith.constant 0 : i32
    return %c0_i32, %c0_i32_0 : i32, i32
  }
  func.func @transform_2(%arg0: i32) -> (i32, i32) {
    %c0_i32 = arith.constant 0 : i32
    %c0_i32_0 = arith.constant 0 : i32
    %c0_i32_1 = arith.constant 0 : i32
    return %c0_i32, %c0_i32_0 : i32, i32
  }
  func.func @transform_3(%arg0: i32) -> (i32, i32, i32) {
    %c0_i32 = arith.constant 0 : i32
    %c0_i32_0 = arith.constant 0 : i32
    %c0_i32_1 = arith.constant 0 : i32
    return %arg0, %c0_i32, %c0_i32_0 : i32, i32, i32
  }
}

</mosaic_0001>

<bundles_post_ra>
// kernel: tpu_custom_call.1
= control target key start
LH: loop header
LB: loop body
LE: loop exit
PB: predicated region body
PF: predicated region fallthrough
CT: control target
= control target key end

     0   :  { %8 = vsyncpa [#allocation3], 0  ;;  %s604_s0 = inlined_call_operand.vmem [shape: f32[2,8,32], index: 0, kind: input, shape index: {}]   ;;  %s605_s1 = inlined_call_operand.vmem [shape: f32[32,16], index: 1, kind: input, shape index: {}]   ;;  %s606_s2 = inlined_call_operand.vmem [shape: f32[1,16], index: 2, kind: input, shape index: {}]   ;;  %s607_s3 = inlined_call_operand.hbm [shape: f32[2,8,48], index: 3, kind: output, shape index: {}]  }
   0x1   :  { %10 = vsyncpa [#allocation3 + $0x1], 0  ;;  %s494_s12 = smov 0   ;;  %s496_s13 = smov 0  }
   0x2   :  { %s498_s14 = smov 0   ;;  %s500_s15 = smov 0  }
   0x3 LB: > { %s515_s16 = sadd.s32 4294967295, %s468_s15   ;;  %s339_s17 = sadd.s32 4294967294, %s468_s15   ;;  %s468_s15 = sphi %s500_s15, %s613_s15   ;;  %s464_s14 = sphi %s498_s14, %s612_s14   ;;  %s460_s13 = sphi %s496_s13, %s611_s13   ;;  %s456_s12 = sphi %s494_s12, %s610_s12  }
   0x4   : > { %s519_s18 = sadd.s32 1, %s468_s15   ;;  %s91_s19 = sadd.s32 1, %s464_s14 }
   0x5   : > { %s88_s20 = ssub.s32 %s468_s15, %s519_s18  ;;  %p101_p0 = scmp.ne.s32.totalorder %s464_s14, %s460_s13 }
   0x6   : > { %p89_p1 = scmp.eq.s32.totalorder %s88_s20, 0  ;;  %p102_p2 = scmp.eq.s32.totalorder %s515_s16, 1 }
   0x7   : > { %p107_p3 = scmp.ne.s32.totalorder %s460_s13, %s456_s12  ;;  %p108_p4 = scmp.eq.s32.totalorder %s339_s17, 1 }
   0x8   : > { %s530_s21 = scalar_select %p89_p1, %s464_s14, %s91_s19  }
   0x9   : > { %p532_p5 = por %p102_p2, %p101_p0  ;;  %p536_p6 = por %p108_p4, %p107_p3 }
   0xa   : > { %p342_p7 = scmp.ge.s32.totalorder %s468_s15, 1  ;;  %p139_p8 = scmp.lt.s32.totalorder %s468_s15, 3 }
   0xc   : > { %p140_p9 = pnand %p342_p7, %p139_p8 }
   0xd   : > { %p162_p10 = scmp.lt.s32.totalorder (!%p140_p9), %s515_s16, 1  ;;  %s472_s17 = smov (!%p140_p9), 32  }
   0xe   : > { %143 = sbr.rel (%p140_p9) target bundleno = 367 (0x16f), region = 32  ;;  %s159_s19 = sand.u32 (!%p140_p9), 1, %s460_s13  }
   0xf   : > { %s343_s20 = sshll.u32 (!%p140_p9), %s159_s19, 3  ;;  %s347_s24 = sshll.u32 (!%p140_p9), %s515_s16, 7 }
  0x10   : > { %s161_s25 = scalar_lea.vmem (!%p140_p9), [#allocation2], %s343_s20  ;;  %s568_s29 = scalar_lea.hbm (!%p140_p9), %s607_s3, %s347_s24 }
  0x11   : > { %s280_s26 = sshll.u32 (!%p140_p9), %s161_s25, 4  ;;  %s267_s30 = scalar_lea.sflag (!%p140_p9), [#allocation3], %s159_s19  ;;  %s281_s26 = int_to_ptr.vmem [resolvable:$true] %s280_s26 }
  0x13   : > { %v170_v0 = vld [vmem:[%s605_s1 + $0x18] sm:$0xff]  ;;  %v470_v1 = vmov 0.0   ;;  %v169_v2 = vld [vmem:[%s605_s1 + $0x10] sm:$0xff]  ;;  %vm471_vm0 = vmmov 0   ;;  %s163_s28 = scalar_select %p162_p10, %s515_s16, 1  ;;  %v168_v3 = vld [vmem:[%s605_s1 + $0x8] sm:$0xff]  ;;  %v255_v11 = vlaneseq }
  0x14   : > { %355 = vmatprep.subr.mxu0 %v470_v1  ;;  %363 = vmatprep.mubr.msk.f32.mxu0 %vm471_vm0, %v470_v1  ;;  %v167_v4 = vld [vmem:[%s605_s1] sm:$0xff]  ;;  %vm171_vm1 = vcmask 261120   ;;  %vm245_vm2 = vcmask 130048   ;;  %vm264_vm3 = vcmask 392192   ;;  %s473_s16 = smov [#allocation2]  }
  0x15   : > { %356 = vmatpush3.msra.mxu0 %v170_v0  ;;  %s344_s4 = sshll.u32 %s163_s28, 3  ;;  %v256_v14 = vshrl.u32 %v255_v11, 7  ;;  %v253_v16 = vld [vmem:[%s606_s2] sm:$0x1]  ;;  %s412_s5 = sshll.u32 %s473_s16, 4  ;;  %s413_s5 = int_to_ptr.vmem [resolvable:$false] %s412_s5 }
  0x16   : > { %357 = vmatprep.subr.mxu0 %v470_v1  ;;  %s165_s9 = scalar_lea.vmem %s604_s0, %s344_s4  ;;  %s408_s4 = scalar_lea.vmem %s281_s26, 128 }
  0x17   : > { %358 = vmatpush3.msra.mxu0 %v169_v2  ;;  %v166_v5 = vld [vmem:[%s165_s9] sm:$0xff]  ;;  %v257_v18 = vsub.s32 0, %v256_v14  ;;  %p409_p11 = scmp.ne.s32.totalorder %s281_s26, %s408_s4  ;;  %s414_s6 = scalar_lea.vmem %s413_s5, 256 }
  0x18   : > { %359 = vmatprep.subr.mxu0 %v470_v1  ;;  %p415_p0 = scmp.lt.s32.totalorder %s281_s26, %s413_s5  ;;  %p416_p1 = scmp.lt.s32.totalorder %s414_s6, %s408_s4 }
  0x19   : > { %360 = vmatpush3.msra.mxu0 %v168_v3  ;;  %p410_p12 = pnand %p409_p11, %p532_p5 }
  0x1a   : > { %361 = vmatprep.subr.mxu0 %v470_v1  ;;  %p417_p2 = por %p416_p1, %p415_p0 }
  0x1b   : > { %362 = vmatpush3.msra.mxu0 %v167_v4  ;;  %p411_p13 = pneg %p410_p12 }
  0x1c   : > { %364 = vmatmul.mubr.msk.f32.vlgmr.msra.gmra.mxu0 %vm171_vm1, %v166_v5 }
  0x1d   : > { %p418_p3 = pnand %p417_p2, %p411_p13 }
  0xdc   : > { %v241_v6 = vpop.f32.mrf.mxu0 }
  0xdd   : > { %v246_v7 = vsel %vm245_vm2, %v241_v6, -inf }
  0xde   : > { %v247_v8 = vrot.slane %v246_v7, 4  ;;  %v365_v9 = vpop.f32.mrf.mxu0 }
  0xe0   : > { %v248_v10 = vmax.f32 %v246_v7, %v247_v8 }
  0xe2   : > { %v249_v12 = vrot.slane %v248_v10, 2 }
  0xe4   : > { %v250_v13 = vmax.f32 %v248_v10, %v249_v12 }
  0xe6   : > { %v251_v15 = vrot.slane %v250_v13, 1 }
  0xe8   : > { %v252_v17 = vmax.f32 %v250_v13, %v251_v15 }
  0xea   : > { %v254_v19 = vadd.f32 %v253_v16, %v252_v17 }
  0xec   : > { %v258_v20 = vrot.slane %v254_v19, %v257_v18 }
  0xee   : > { %260 = vrot.lane.b32.xlu0 %v258_v20, %s472_s17 }
 0x160   : > { %v261_v21 = vpop.permute.xlu0 %260 }
 0x161   : > { %v263_v22 = vsel %vm171_vm1, %v166_v5, %v261_v21 }
 0x162   : > { %265 = vst.msk [vmem:[%s161_s25] sm:$0xff] %vm264_vm3, %v263_v22 }
 0x163   : > { %421 = shalt.err (!%p418_p3)
}
 0x164   : > { %s422_s7 = scalar_lea.hbm %s568_s29, 128  ;;  %s426_s10 = scalar_lea.hbm %s607_s3, 256 }
 0x165   : > { %p423_p4 = scmp.ne.s32.totalorder %s568_s29, %s422_s7  ;;  %p427_p9 = scmp.lt.s32.totalorder %s568_s29, %s607_s3 }
 0x166   : > { %p428_p10 = scmp.lt.s32.totalorder %s426_s10, %s422_s7 }
 0x167   : > { %p424_p7 = pnand %p423_p4, %p532_p5 }
 0x168   : > { %p429_p11 = por %p428_p10, %p427_p9 }
 0x169   : > { %p425_p8 = pneg %p424_p7 }
 0x16b   : > { %p430_p12 = pnand %p429_p11, %p425_p8 }
 0x16d   : > { %433 = shalt.err (!%p430_p12)
}
 0x16e   : > { %366 = dma.vmem_to_hbm [thread:$0]  (%p532_p5), %s281_s26, 128, %s568_s29, %s267_s30  }
 0x16f PF: > { %p372_p13 = scmp.ge.s32.totalorder %s468_s15, 2  ;;  %s292_s19 = sand.u32 1, %s456_s12  }
 0x170   : > { %s293_s20 = scalar_lea.sflag [#allocation3], %s292_s19 }
 0x171   : > { %p369_p0 = pnand %p372_p13, %p536_p6 }
 0x173   : > { %p370_p1 = pneg %p369_p0 }
 0x175   : > { %451 = dma.done.wait (%p370_p1), %s293_s20, 128  }
 0x176   : > { %453 = vsyncadd (%p370_p1), %s293_s20, 4294967168  ;;  %p13_p2 = scmp.ge.s32.totalorder %s519_s18, 4   ;;  %s610_s12 = smov %s460_s13 }
 0x177   : > { %s611_s13 = smov %s464_s14  ;;  %s612_s14 = smov %s530_s21 }
 0x178   : > { %s613_s15 = smov %s519_s18  ;;  %15 = sbr.rel (!%p13_p2) target bundleno = 3 (0x3), region = 67 }
 0x17d   :  { %298 = vsyncpa [#allocation3], 1 }
 0x17e   :  { %300 = vsyncpa [#allocation3 + $0x1], 1 }

</bundles_post_ra>
